<compile_context>
chip_gen: v7x
topology: tpu7x:2x2x1
jax: 0.10.0
libtpu: 0.0.40
codegen_flags: <defaults>
</compile_context>

<pallas_src>
import functools

import jax
import jax.numpy as jnp
from jax.experimental import pallas as pl
from jax.experimental.pallas import tpu as pltpu


def _round_up(a, b):
    return ((a + b - 1) // b) * b


def _mlp_kernel(x_ref, w1_ref, w3_ref, w2_ref, o_ref, *scratch, kf):
    x = x_ref[...]                                                   # [tm, H] native dtype
    g = jnp.dot(x, w1_ref[...], preferred_element_type=jnp.float32)  # [tm, tf] gate
    u = jnp.dot(x, w3_ref[...], preferred_element_type=jnp.float32)  # [tm, tf] up
    h = g * jax.nn.sigmoid(g) * u                                    # f32 SiLU * up (VPU + EUP)
    part = jnp.dot(h.astype(w2_ref.dtype), w2_ref[...],
                   preferred_element_type=jnp.float32)               # [tm, H] partial down-proj

    if kf == 1:
        # Single F tile: write straight to the output, no accumulator traffic.
        o_ref[...] = part.astype(o_ref.dtype)
        return

    acc_ref = scratch[0]
    k = pl.program_id(1)

    @pl.when(k == 0)
    def _():
        acc_ref[...] = part                                          # no zero-init pass

    @pl.when(jnp.logical_and(k > 0, k < kf - 1))
    def _():
        acc_ref[...] = acc_ref[...] + part

    @pl.when(k == kf - 1)
    def _():
        o_ref[...] = (acc_ref[...] + part).astype(o_ref.dtype)       # no acc store + copy


@functools.partial(jax.jit, static_argnames=("tm", "tf"))
def mixtral_mlp(x, w1t, w3t, w2t, *, tm=None, tf=None):
    """x: [T, H]; w1t/w3t: [H, F]; w2t: [F, H]. Returns [T, H] in x.dtype."""
    T, H = x.shape
    F = w1t.shape[1]
    assert w3t.shape == (H, F) and w2t.shape == (F, H)

    x_isz = jnp.dtype(x.dtype).itemsize
    w_isz = jnp.dtype(w1t.dtype).itemsize
    sub = max(8, 32 // x_isz)                      # sublane packing for x dtype

    # ---- generation-aware VMEM budget --------------------------------------
    try:
        info = pltpu.get_tpu_info()
        vmem_cap = int(getattr(info, "vmem_capacity_bytes", 64 * 1024 * 1024))
    except Exception:
        vmem_cap = 64 * 1024 * 1024                # conservative fallback (v7x-sized)
    big_vmem = vmem_cap >= 96 * 1024 * 1024        # v5e/v6e: 128 MiB, 1 TC; v7x: 64 MiB, 2 TC
    vmem_limit = (100 if big_vmem else 44) * 1024 * 1024

    # ---- token tile ---------------------------------------------------------
    if tm is None:
        if x_isz <= 2:
            tm_max = 512 if big_vmem else 256
        else:
            tm_max = 256 if big_vmem else 128
        tm = min(tm_max, _round_up(T, sub))
        T_pad = _round_up(T, tm)
        if not big_vmem:
            # v7x megacore: ensure both TensorCores get a token tile when possible.
            while T_pad // tm < 2 and tm > sub:
                tm = max(sub, _round_up(tm // 2, sub))
                T_pad = _round_up(T, tm)
    T_pad = _round_up(T, tm)

    # ---- F tile: largest 128-multiple whose double-buffered weight tiles
    #      (w1 + w3 + w2 = 6*H*tf bytes) fit the remaining VMEM budget. -------
    token_bytes = (4 * x_isz + 4) * tm * H         # 2x x + 2x out (double-buffered) + f32 acc
    if tf is None:
        budget = max(vmem_limit - token_bytes - 6 * 1024 * 1024,
                     6 * H * 128 * w_isz)
        cap = max(128, budget // (6 * H * w_isz))
        if F <= cap:
            tf = F                                  # whole F per step (block == full dim)
        else:
            tf = max(128, (cap // 128) * 128)
            if F % 128 == 0:                        # prefer an exact divisor: no weight padding
                while tf > 128 and F % tf:
                    tf -= 128

    # ---- pad F so tf divides it (zero columns/rows contribute exactly 0) ----
    F_pad = _round_up(F, tf)
    if F_pad != F:
        # TODO(synk): in production pad the weights once at load time, not per call.
        w1t = jnp.pad(w1t, ((0, 0), (0, F_pad - F)))
        w3t = jnp.pad(w3t, ((0, 0), (0, F_pad - F)))
        w2t = jnp.pad(w2t, ((0, F_pad - F), (0, 0)))
    kf = F_pad // tf

    x_p = jnp.pad(x, ((0, T_pad - T), (0, 0))) if T_pad != T else x

    n_tok_tiles = T_pad // tm
    weight_streams = 1 if kf == 1 else n_tok_tiles  # weights re-streamed per token tile
    cost = pl.CostEstimate(
        flops=6 * T_pad * H * F_pad,                # three matmuls
        transcendentals=T_pad * F_pad,              # sigmoid
        bytes_accessed=2 * T_pad * H * x_isz + weight_streams * 3 * H * F_pad * w_isz,
    )

    scratch = [] if kf == 1 else [pltpu.VMEM((tm, H), jnp.float32)]

    out = pl.pallas_call(
        functools.partial(_mlp_kernel, kf=kf),
        out_shape=jax.ShapeDtypeStruct((T_pad, H), x.dtype),
        grid_spec=pltpu.PrefetchScalarGridSpec(
            num_scalar_prefetch=0,
            grid=(n_tok_tiles, kf),                             # tokens (parallel), F reduction (last)
            in_specs=[
                pl.BlockSpec((tm, H), lambda i, k: (i, 0)),     # x token tile (resident over k)
                pl.BlockSpec((H, tf), lambda i, k: (0, k)),     # w1^T F-tile
                pl.BlockSpec((H, tf), lambda i, k: (0, k)),     # w3^T F-tile
                pl.BlockSpec((tf, H), lambda i, k: (k, 0)),     # w2^T F-tile
            ],
            out_specs=pl.BlockSpec((tm, H), lambda i, k: (i, 0)),
            scratch_shapes=scratch,
        ),
        compiler_params=pltpu.CompilerParams(
            dimension_semantics=("parallel", "arbitrary"),
            vmem_limit_bytes=vmem_limit,
        ),
        cost_estimate=cost,
    )(x_p, w1t, w3t, w2t)

    return out[:T] if T_pad != T else out


def _ref_mlp(x, w1t, w3t, w2t):
    xf = x.astype(jnp.float32)
    g = xf @ w1t.astype(jnp.float32)
    u = xf @ w3t.astype(jnp.float32)
    h = jax.nn.silu(g) * u
    return (h @ w2t.astype(jnp.float32)).astype(x.dtype)


if __name__ == "__main__":
    key = jax.random.PRNGKey(0)

    # ---- Test 1: toy config matching the module (hidden=32, intermediate=64), f32.
    T, H, F = 8, 32, 64
    kx, k1, k2, k3 = jax.random.split(key, 4)
    b1 = 1.0 / (H ** 0.5)
    b2 = 1.0 / (F ** 0.5)
    w1t = jax.random.uniform(k1, (H, F), jnp.float32, minval=-b1, maxval=b1)
    w3t = jax.random.uniform(k3, (H, F), jnp.float32, minval=-b1, maxval=b1)
    w2t = jax.random.uniform(k2, (F, H), jnp.float32, minval=-b2, maxval=b2)
    x = jax.random.normal(kx, (T, H), jnp.float32)

    out = jax.block_until_ready(mixtral_mlp(x, w1t, w3t, w2t))
    ref = _ref_mlp(x, w1t, w3t, w2t)
    assert out.shape == (T, H) and out.dtype == x.dtype
    assert jnp.allclose(out, ref, atol=1e-5, rtol=1e-5), "f32 mismatch vs reference"

    # ---- Test 2: tiled/padded path (bf16, multi-tile grid, ragged T, kf > 2).
    T2, H2, F2 = 40, 128, 512
    kx2, k1b, k2b, k3b = jax.random.split(jax.random.PRNGKey(1), 4)
    b1 = 1.0 / (H2 ** 0.5)
    b2 = 1.0 / (F2 ** 0.5)
    w1b = jax.random.uniform(k1b, (H2, F2), jnp.float32, minval=-b1, maxval=b1).astype(jnp.bfloat16)
    w3b = jax.random.uniform(k3b, (H2, F2), jnp.float32, minval=-b1, maxval=b1).astype(jnp.bfloat16)
    w2b = jax.random.uniform(k2b, (F2, H2), jnp.float32, minval=-b2, maxval=b2).astype(jnp.bfloat16)
    xb = jax.random.normal(kx2, (T2, H2), jnp.float32).astype(jnp.bfloat16)

    out2 = jax.block_until_ready(mixtral_mlp(xb, w1b, w3b, w2b, tm=16, tf=128))
    ref2 = _ref_mlp(xb, w1b, w3b, w2b)
    assert out2.shape == (T2, H2) and out2.dtype == xb.dtype
    assert jnp.allclose(out2.astype(jnp.float32), ref2.astype(jnp.float32),
                        atol=2e-2, rtol=2e-2), "bf16 mismatch vs reference"

    # ---- Test 3: F not divisible by tf (zero-padded weight tiles), f32.
    T3, H3, F3 = 8, 128, 192
    kx3, k1c, k2c, k3c = jax.random.split(jax.random.PRNGKey(2), 4)
    b1 = 1.0 / (H3 ** 0.5)
    b2 = 1.0 / (F3 ** 0.5)
    w1c = jax.random.uniform(k1c, (H3, F3), jnp.float32, minval=-b1, maxval=b1)
    w3c = jax.random.uniform(k3c, (H3, F3), jnp.float32, minval=-b1, maxval=b1)
    w2c = jax.random.uniform(k2c, (F3, H3), jnp.float32, minval=-b2, maxval=b2)
    xc = jax.random.normal(kx3, (T3, H3), jnp.float32)

    out3 = jax.block_until_ready(mixtral_mlp(xc, w1c, w3c, w2c, tf=128))
    ref3 = _ref_mlp(xc, w1c, w3c, w2c)
    assert out3.shape == (T3, H3) and out3.dtype == xc.dtype
    assert jnp.allclose(out3, ref3, atol=1e-5, rtol=1e-5), "padded-F mismatch vs reference"

    print("KERNEL_OK")
</pallas_src>

<mosaic_0001>
module attributes {stable_mosaic.version = 11 : i64} {
  func.func @_mlp_kernel(%arg0: i32, %arg1: i32, %arg2: memref<8x32xf32, #tpu.memory_space<vmem>>, %arg3: memref<32x64xf32, #tpu.memory_space<vmem>>, %arg4: memref<32x64xf32, #tpu.memory_space<vmem>>, %arg5: memref<64x32xf32, #tpu.memory_space<vmem>>, %arg6: memref<8x32xf32, #tpu.memory_space<vmem>>) attributes {dimension_semantics = [#tpu.dimension_semantics<parallel>, #tpu.dimension_semantics<arbitrary>], iteration_bounds = array<i64: 1, 1>, scalar_prefetch = 0 : i64, scratch_operands = 0 : i64, tpu.core_type = #tpu.core_type<tc>, window_params = [{transform_indices = @transform_0, window_bounds = array<i64: 8, 32>}, {transform_indices = @transform_1, window_bounds = array<i64: 32, 64>}, {transform_indices = @transform_2, window_bounds = array<i64: 32, 64>}, {transform_indices = @transform_3, window_bounds = array<i64: 64, 32>}, {transform_indices = @transform_4, window_bounds = array<i64: 8, 32>}]} {
    %c0 = arith.constant 0 : index
    %c0_0 = arith.constant 0 : index
    %0 = vector.load %arg2[%c0, %c0_0] : memref<8x32xf32, #tpu.memory_space<vmem>>, vector<8x32xf32>
    %c0_1 = arith.constant 0 : index
    %c0_2 = arith.constant 0 : index
    %1 = vector.load %arg3[%c0_1, %c0_2] : memref<32x64xf32, #tpu.memory_space<vmem>>, vector<32x64xf32>
    %cst = arith.constant dense<0.000000e+00> : vector<8x64xf32>
    %2 = tpu.matmul %0, %1, %cst {dimension_numbers = #tpu.dot_dimension_numbers<[1], [0], [0], [1], [0, 0, 1, 1], [], []>} : vector<8x32xf32>, vector<32x64xf32>, vector<8x64xf32> -> vector<8x64xf32>
    %c0_3 = arith.constant 0 : index
    %c0_4 = arith.constant 0 : index
    %3 = vector.load %arg4[%c0_3, %c0_4] : memref<32x64xf32, #tpu.memory_space<vmem>>, vector<32x64xf32>
    %cst_5 = arith.constant dense<0.000000e+00> : vector<8x64xf32>
    %4 = tpu.matmul %0, %3, %cst_5 {dimension_numbers = #tpu.dot_dimension_numbers<[1], [0], [0], [1], [0, 0, 1, 1], [], []>} : vector<8x32xf32>, vector<32x64xf32>, vector<8x64xf32> -> vector<8x64xf32>
    %5 = arith.negf %2 : vector<8x64xf32>
    %6 = math.exp %5 : vector<8x64xf32>
    %cst_6 = arith.constant 1.000000e+00 : f32
    %7 = vector.broadcast %cst_6 : f32 to vector<8x64xf32>
    %8 = arith.addf %7, %6 : vector<8x64xf32>
    %9 = arith.divf %7, %8 : vector<8x64xf32>
    %10 = arith.mulf %2, %9 : vector<8x64xf32>
    %11 = arith.mulf %10, %4 : vector<8x64xf32>
    %c0_7 = arith.constant 0 : index
    %c0_8 = arith.constant 0 : index
    %12 = vector.load %arg5[%c0_7, %c0_8] : memref<64x32xf32, #tpu.memory_space<vmem>>, vector<64x32xf32>
    %cst_9 = arith.constant dense<0.000000e+00> : vector<8x32xf32>
    %13 = tpu.matmul %11, %12, %cst_9 {dimension_numbers = #tpu.dot_dimension_numbers<[1], [0], [0], [1], [0, 0, 1, 1], [], []>} : vector<8x64xf32>, vector<64x32xf32>, vector<8x32xf32> -> vector<8x32xf32>
    %c0_10 = arith.constant 0 : index
    %c0_11 = arith.constant 0 : index
    %14 = vector.load %arg6[%c0_10, %c0_11] : memref<8x32xf32, #tpu.memory_space<vmem>>, vector<8x32xf32>
    tpu.vector_store %arg6[%c0_10, %c0_11], %13 {strides = array<i32>} : memref<8x32xf32, #tpu.memory_space<vmem>>, vector<8x32xf32>,
    return
  }
  func.func @transform_0(%arg0: i32, %arg1: i32) -> (i32, i32) {
    %c0_i32 = arith.constant 0 : i32
    %c0_i32_0 = arith.constant 0 : i32
    return %arg0, %c0_i32 : i32, i32
  }
  func.func @transform_1(%arg0: i32, %arg1: i32) -> (i32, i32) {
    %c0_i32 = arith.constant 0 : i32
    %c0_i32_0 = arith.constant 0 : i32
    return %c0_i32, %arg1 : i32, i32
  }
  func.func @transform_2(%arg0: i32, %arg1: i32) -> (i32, i32) {
    %c0_i32 = arith.constant 0 : i32
    %c0_i32_0 = arith.constant 0 : i32
    return %c0_i32, %arg1 : i32, i32
  }
  func.func @transform_3(%arg0: i32, %arg1: i32) -> (i32, i32) {
    %c0_i32 = arith.constant 0 : i32
    %c0_i32_0 = arith.constant 0 : i32
    return %arg1, %c0_i32 : i32, i32
  }
  func.func @transform_4(%arg0: i32, %arg1: i32) -> (i32, i32) {
    %c0_i32 = arith.constant 0 : i32
    %c0_i32_0 = arith.constant 0 : i32
    return %arg0, %c0_i32 : i32, i32
  }
}

</mosaic_0001>

<bundles_post_ra>
// kernel: mixtral_mlp.1
= control target key start
LH: loop header
LB: loop body
LE: loop exit
PB: predicated region body
PF: predicated region fallthrough
CT: control target
= control target key end

     0   :  { %v396_v3 = vmov 0.0|0.0   ;;  %vm397_vm0 = vmmov 0   ;;  %v398_v6 = vmov 0.0   ;;  %s494_s0 = inlined_call_operand.vmem [shape: f32[8,32], index: 0, kind: input, shape index: {}]   ;;  %s495_s1 = inlined_call_operand.vmem [shape: f32[32,64], index: 1, kind: input, shape index: {}]   ;;  %s496_s2 = inlined_call_operand.vmem [shape: f32[32,64], index: 2, kind: input, shape index: {}]   ;;  %s497_s3 = inlined_call_operand.vmem [shape: f32[64,32], index: 3, kind: input, shape index: {}]   ;;  %s498_s4 = inlined_call_operand.hbm [shape: f32[8,32], index: 4, kind: output, shape index: {}]  }
   0x1   :  { %v19_v0 = vld [vmem:[%s495_s1] sm:$0xff]  ;;  %v20_v1 = vld [vmem:[%s495_s1 + $0x8] sm:$0xff]  ;;  %v21_v2 = vld [vmem:[%s495_s1 + $0x10] sm:$0xff]  ;;  %340 = vmatprep.subr.bf16.mxu1 %v396_v3  ;;  %307 = vmatprep.mubr.msk.f32.mxu1 %vm397_vm0, %v398_v6 }
   0x2   :  { %v341_v4 = vpack.c.bf16 %v20_v1, %v19_v0  ;;  %v22_v5 = vld [vmem:[%s495_s1 + $0x18] sm:$0xff]  ;;  %352 = vmatprep.subr.bf16.mxu0 %v396_v3  ;;  %337 = vmatprep.mubr.msk.f32.mxu0 %vm397_vm0, %v398_v6 }
   0x3   :  { %v344_v7 = vpack.c.bf16 %v22_v5, %v21_v2 }
   0x4   :  { %342 = vmatpush3.bf16.msra.mxu1 %v341_v4 }
   0x5   :  { %9 = vsyncpa [#allocation3], 0  ;;  %343 = vmatprep.subr.bf16.mxu1 %v396_v3  ;;  %v97_v8 = vld [vmem:[%s496_s2] sm:$0xff]  ;;  %v98_v9 = vld [vmem:[%s496_s2 + $0x8] sm:$0xff]  ;;  %vm23_vm1 = vcmask 261120   ;;  %vm187_vm2 = vcmask 523264  }
   0x6   :  { %v18_v10 = vld [vmem:[%s494_s0] sm:$0xff]  ;;  %v347_v11 = vpack.c.bf16 %v98_v9, %v97_v8  ;;  %v99_v12 = vld [vmem:[%s496_s2 + $0x10] sm:$0xff]  ;;  %v100_v13 = vld [vmem:[%s496_s2 + $0x18] sm:$0xff]  ;;  %s399_s20 = smov [#allocation2]  }
   0x7   :  { %v350_v14 = vpack.c.bf16 %v100_v13, %v99_v12  ;;  %v179_v15 = vld [vmem:[%s497_s3] sm:$0xff]  ;;  %v180_v16 = vld [vmem:[%s497_s3 + $0x8] sm:$0xff]  ;;  %v181_v18 = vld [vmem:[%s497_s3 + $0x10] sm:$0xff]  ;;  %s268_s21 = sshll.u32 %s399_s20, 4  ;;  %s269_s21 = int_to_ptr.vmem [resolvable:$true] %s268_s21 }
   0x8   :  { %345 = vmatpush3.bf16.msra.mxu1 %v344_v7  ;;  %v353_v17 = vpack.c.bf16 %v180_v16, %v179_v15  ;;  %v182_v19 = vld [vmem:[%s497_s3 + $0x18] sm:$0xff]  ;;  %v183_v21 = vld [vmem:[%s497_s3 + $0x20] sm:$0xff]  ;;  %v184_v22 = vld [vmem:[%s497_s3 + $0x28] sm:$0xff]  ;;  %p377_p1 = scmp.lt.s32.totalorder %s269_s21, %s269_s21 }
   0x9   :  { %346 = vmatprep.subr.bf16.mxu1 %v396_v3  ;;  %v356_v20 = vpack.c.bf16 %v182_v19, %v181_v18  ;;  %v359_v23 = vpack.c.bf16 %v184_v22, %v183_v21  ;;  %v185_v24 = vld [vmem:[%s497_s3 + $0x30] sm:$0xff]  ;;  %v186_v25 = vld [vmem:[%s497_s3 + $0x38] sm:$0xff]  ;;  %s372_s3 = scalar_lea.vmem %s269_s21, 128 }
   0xa   :  { %354 = vmatpush3.bf16.msra.mxu0 %v353_v17  ;;  %v362_v26 = vpack.c.bf16 %v186_v25, %v185_v24  ;;  %p373_p0 = scmp.ne.s32.totalorder %s269_s21, %s372_s3  ;;  %p378_p2 = scmp.lt.s32.totalorder %s372_s3, %s372_s3 }
   0xb   :  { %308 = vmatmul.mubr.msk.f32.vlgmr.msra.gmra.mrb[0].mxu1 %vm23_vm1, %v18_v10  ;;  %355 = vmatprep.subr.bf16.mxu0 %v396_v3 }
   0xc   :  { %348 = vmatpush3.bf16.msra.mxu1 %v347_v11  ;;  %318 = vmatprep.mubr.msk.f32.mxu1 %vm397_vm0, %v398_v6  ;;  %p379_p3 = por %p378_p2, %p377_p1 }
   0xd   :  { %349 = vmatprep.subr.bf16.mxu1 %v396_v3 }
   0xe   :  { %357 = vmatpush3.bf16.msra.mxu0 %v356_v20  ;;  %p380_p4 = pnand %p379_p3, %p373_p0 }
   0xf   :  { %358 = vmatprep.subr.bf16.mxu0 %v396_v3 }
  0x10   :  { %351 = vmatpush3.bf16.msra.mxu1 %v350_v14 }
  0x12   :  { %360 = vmatpush3.bf16.msra.mxu0 %v359_v23 }
  0x13   :  { %319 = vmatmul.mubr.msk.f32.vlgmr.msra.gmra.mrb[2].mxu1 %vm23_vm1, %v18_v10  ;;  %361 = vmatprep.subr.bf16.mxu0 %v396_v3 }
  0x16   :  { %363 = vmatpush3.bf16.msra.mxu0 %v362_v26 }
  0xde   :  { %v93_v27 = vpop.f32.mrb[0].mxu1 }
  0xdf   :  { %v278_v28 = vmul.f32 -1.442695, %v93_v27  ;;  %v309_v29 = vpop.f32.mrb[1].mxu1 }
  0xe1   :  { %368 = vpow2.f32 %v278_v28 }
  0xe6   :  { %v167_v30 = vpop.f32.mrb[2].mxu1 }
  0xe7   :  { %v320_v31 = vpop.f32.mrb[3].mxu1 }
  0xeb   :  { %v369_v32 = vpop.eup %368 }
  0xec   :  { %v174_v33 = vadd.f32 1.0, %v369_v32 }
  0xee   :  { %370 = vrcp.f32 %v174_v33 }
  0xf8   :  { %v371_v34 = vpop.eup %370 }
  0xf9   :  { %v177_v35 = vmul.f32 %v371_v34, %v93_v27 }
  0xfb   :  { %v178_v36 = vmul.f32 %v177_v35, %v167_v30 }
  0xfd   :  { %338 = vmatmul.mubr.msk.f32.vlgmr.msra.gmra.mrb[0].mxu0 %vm187_vm2, %v178_v36 }
 0x1d0   :  { %v257_v37 = vpop.f32.mrb[0].mxu0 }
 0x1d1   :  { %261 = vst.msk [vmem:[#allocation2] sm:$0xff] %vm23_vm1, %v257_v37  ;;  %v339_v38 = vpop.f32.mrb[1].mxu0 }
 0x1d2   :  { %383 = shalt.err (!%p380_p4)
}
 0x1d3   :  { %s384_s24 = scalar_lea.hbm %s498_s4, 128 }
 0x1d4   :  { %p385_p5 = scmp.ne.s32.totalorder %s498_s4, %s384_s24  ;;  %p388_p6 = scmp.lt.u32.totalorder %s384_s24, %s498_s4 }
 0x1d6   :  { %p390_p7 = pnand %p388_p6, %p385_p5 }
 0x1d8   :  { %393 = shalt.err (!%p390_p7)
}
 0x1d9   :  { %271 = dma.vmem_to_hbm [thread:$0]  %s269_s21, 128, %s498_s4, [#allocation3]  }
 0x1da   :  { %394 = dma.done.wait [#allocation3], 128  }
 0x1db   :  { %395 = vsyncadd [#allocation3], 4294967168 }
 0x1dc   :  { %275 = vsyncpa [#allocation3], 1 }

</bundles_post_ra>
